<compile_context>
chip_gen: v7x
topology: tpu7x:2x2x1
jax: 0.10.0
libtpu: 0.0.40
codegen_flags: <defaults>
</compile_context>

<pallas_src>
import functools

import jax
import jax.numpy as jnp
from jax.experimental import pallas as pl
from jax.experimental.pallas import tpu as pltpu

_LANES = 128
_NUM_SPLITS = 2          # leading "parallel" grid axis (feeds both TCs on v7x)
_MAX_TILE_ROWS = 2048    # 2048 rows * 128 lanes * 4 B = 1 MiB per input buffer


def _round_up(x, m):
    return ((x + m - 1) // m) * m


def _image_loss_kernel(pred_ref, targ_ref, acc_ref):
    """Partial sum((p-t)^2) and sum(|p-t|) over one (tile_rows, 128) tile.

    Grid: (num_splits, tiles_per_split). Axis 0 is "parallel", axis 1 is the
    "arbitrary" reduction axis. The (2, 8, 128) output block is indexed only by
    the split axis, so it stays resident in VMEM across the reduction and acts
    as a lane/sublane-parallel accumulator (row 0 = squared diffs, row 1 = abs).
    """
    t = pl.program_id(1)

    @pl.when(t == 0)
    def _init():
        acc_ref[...] = jnp.zeros_like(acc_ref)

    d = pred_ref[...].astype(jnp.float32) - targ_ref[...].astype(jnp.float32)
    # Fold the tile's (8, 128) sublane-blocks with vreg-wise VPU adds (no XLU).
    d3 = d.reshape(d.shape[0] // 8, 8, _LANES)
    acc_ref[0, :, :] += jnp.sum(d3 * d3, axis=0)
    acc_ref[1, :, :] += jnp.sum(jnp.abs(d3), axis=0)


def _image_loss_sums(pred, targ):
    """Returns (sum((pred-targ)^2), sum(|pred-targ|), n_real_elements)."""
    assert pred.shape == targ.shape
    total = 1
    for s in pred.shape:
        total *= s

    rows = _round_up(total, _LANES) // _LANES
    rows_per_split = -(-rows // _NUM_SPLITS)
    tile_rows = min(_MAX_TILE_ROWS, _round_up(rows_per_split, 8))
    tiles_per_split = -(-rows_per_split // tile_rows)
    padded_rows = _NUM_SPLITS * tiles_per_split * tile_rows
    pad = padded_rows * _LANES - total

    pred_flat = pred.reshape(-1)
    targ_flat = targ.reshape(-1)
    if pad:
        # Zero padding contributes 0 to both sums; divisor counts real elements.
        pred_flat = jnp.pad(pred_flat, (0, pad))
        targ_flat = jnp.pad(targ_flat, (0, pad))
    pred2d = pred_flat.reshape(padded_rows, _LANES)
    targ2d = targ_flat.reshape(padded_rows, _LANES)

    img_index_map = lambda s, t: (s * tiles_per_split + t, 0)

    acc = pl.pallas_call(
        _image_loss_kernel,
        out_shape=jax.ShapeDtypeStruct((_NUM_SPLITS, 2, 8, _LANES), jnp.float32),
        grid_spec=pltpu.PrefetchScalarGridSpec(
            num_scalar_prefetch=0,
            grid=(_NUM_SPLITS, tiles_per_split),
            in_specs=[
                pl.BlockSpec((tile_rows, _LANES), img_index_map),   # pred tile
                pl.BlockSpec((tile_rows, _LANES), img_index_map),   # target tile
            ],
            out_specs=pl.BlockSpec((None, 2, 8, _LANES),
                                   lambda s, t: (s, 0, 0, 0)),
        ),
        compiler_params=pltpu.CompilerParams(
            dimension_semantics=("parallel", "arbitrary"),
        ),
    )(pred2d, targ2d)

    sums = jnp.sum(acc, axis=(0, 2, 3))     # (2,) f32: [sum_sq, sum_abs]
    return sums[0], sums[1], total


@jax.jit
def _raw_losses(output_3d, output_rendered, target_rendered):
    """Raw (unscaled) loss values: (vert_l2, mse, l1)."""
    # vert_l2 is tiny O(V) work; intentionally kept in plain JAX (XLA fuses it)
    # rather than wasting a lane-padded pipelined VMEM slot in the kernel.
    x = output_3d.astype(jnp.float32)
    vert_l2 = jnp.mean(x * x)

    sum_sq, sum_abs, n = _image_loss_sums(output_rendered, target_rendered)
    inv = jnp.float32(1.0 / n)
    return vert_l2, sum_sq * inv, sum_abs * inv


class CombinedLossPallas:
    """Mirror of pixmesh CombinedLoss.forward semantics with Pallas reductions.

    Instead of loading a target mesh / rendered images from disk, the target
    render is provided as a deterministic in-script array.
    """

    def __init__(self, target_name, target_rendered):
        self.target_name = target_name
        # TODO(synk): real module loads/renders the target (load_3d / make_scenes
        # / render); here the target render is a deterministic in-script array.
        self.target_rendered = target_rendered
        self.losses_3d = {}
        self.loss_weights_3d = {}
        self.losses_2d = {}
        self.loss_weights_2d = {}
        self.breakdown = None

    # -- registration API (same shape as the PyTorch module) ---------------
    def add_3d(self, name, scaling_factor):
        self.losses_3d[name] = scaling_factor
        self.loss_weights_3d[name] = 1.0
        return self

    def add_2d(self, name, scaling_factor):
        self.losses_2d[name] = scaling_factor
        self.loss_weights_2d[name] = 1.0
        return self

    def remove_3d(self, name):
        self.losses_3d.pop(name, None)
        self.loss_weights_3d.pop(name, None)
        return self

    def remove_2d(self, name):
        self.losses_2d.pop(name, None)
        self.loss_weights_2d.pop(name, None)
        return self

    def weight_3d(self, name, weight):
        self.loss_weights_3d[name] = weight
        return self

    def weight_2d(self, name, weight):
        self.loss_weights_2d[name] = weight
        return self

    def get_targets(self):
        return self.target_rendered

    def get_last_breakdown(self):
        if self.breakdown is not None:
            return {k: self.breakdown[k] for k in self.breakdown}
        return None

    # -- forward ------------------------------------------------------------
    def forward(self, output_3d, output_rendered):
        vert_l2, mse, l1 = _raw_losses(
            output_3d, output_rendered, self.target_rendered)
        raw_3d = {"vert_l2": vert_l2}
        raw_2d = {"mse": mse, "l1": l1}

        total = None
        names, vals = [], []
        for name_3d in self.losses_3d:
            scale = self.losses_3d[name_3d]
            weight = self.loss_weights_3d.get(name_3d, 1.0)
            if weight < 1e-07:
                continue
            this_loss = raw_3d[name_3d] * scale
            names.append(name_3d)
            vals.append(this_loss)
            total = this_loss * weight if total is None else total + this_loss * weight
        for name_2d in self.losses_2d:
            scale = self.losses_2d[name_2d]
            weight = self.loss_weights_2d.get(name_2d, 1.0)
            if weight < 1e-07:
                continue
            this_loss = raw_2d[name_2d] * scale
            names.append(name_2d)
            vals.append(this_loss)
            total = this_loss * weight if total is None else total + this_loss * weight
        if total is not None:
            names.append("_total")
            vals.append(total)

        # Single device->host transfer for the breakdown dict (instead of one
        # blocking float() per term); `total` stays on-device.
        if vals:
            host_vals = jax.device_get(jnp.stack(vals))
            self.breakdown = {n: float(v) for n, v in zip(names, host_vals)}
        else:
            self.breakdown = {}
        return total

    __call__ = forward


if __name__ == "__main__":
    key = jax.random.PRNGKey(0)
    k1, k2, k3 = jax.random.split(key, 3)

    # Small, module-consistent shapes:
    #   output_3d       : (V, 3) vertex positions, V = 64
    #   rendered images : NCHW = (2 views, 4 channels RGBA, 16, 16)
    V = 64
    N, C, H, W = 2, 4, 16, 16

    output_3d = jax.random.normal(k1, (V, 3), dtype=jnp.float32)
    output_rendered = jax.random.uniform(k2, (N, C, H, W), dtype=jnp.float32)
    target_rendered = jax.random.uniform(k3, (N, C, H, W), dtype=jnp.float32)

    loss_mod = (CombinedLossPallas("synthetic_target", target_rendered)
                .add_3d("vert_l2", 0.1)
                .add_2d("mse", 1.0)
                .add_2d("l1", 0.5)
                .weight_3d("vert_l2", 0.25)
                .weight_2d("l1", 2.0))

    total = loss_mod(output_3d, output_rendered)
    total = jax.block_until_ready(total)

    # reference check in plain JAX
    ref_vert = jnp.mean(output_3d ** 2)
    diff = output_rendered - target_rendered
    ref_mse = jnp.mean(diff ** 2)
    ref_l1 = jnp.mean(jnp.abs(diff))
    ref_total = 0.25 * (ref_vert * 0.1) + 1.0 * (ref_mse * 1.0) + 2.0 * (ref_l1 * 0.5)
    assert abs(float(total) - float(ref_total)) < 1e-5, (float(total), float(ref_total))

    bd = loss_mod.get_last_breakdown()
    assert abs(bd["_total"] - float(ref_total)) < 1e-5, bd

    print("KERNEL_OK")
</pallas_src>

<mosaic_0001>
module attributes {stable_mosaic.version = 11 : i64} {
  func.func @_image_loss_kernel(%arg0: i32, %arg1: i32, %arg2: memref<8x128xf32, #tpu.memory_space<vmem>>, %arg3: memref<8x128xf32, #tpu.memory_space<vmem>>, %arg4: memref<1x2x8x128xf32, #tpu.memory_space<vmem>>) attributes {dimension_semantics = [#tpu.dimension_semantics<parallel>, #tpu.dimension_semantics<arbitrary>], iteration_bounds = array<i64: 2, 1>, scalar_prefetch = 0 : i64, scratch_operands = 0 : i64, tpu.core_type = #tpu.core_type<tc>, window_params = [{transform_indices = @transform_0, window_bounds = array<i64: 8, 128>}, {transform_indices = @transform_1, window_bounds = array<i64: 8, 128>}, {transform_indices = @transform_2, window_bounds = array<i64: 1, 2, 8, 128>}]} {
    %c0_i32 = arith.constant 0 : i32
    %0 = arith.cmpi eq, %arg1, %c0_i32 : i32
    %1 = arith.extui %0 : i1 to i32
    %c0_i32_0 = arith.constant 0 : i32
    %2 = arith.cmpi ne, %1, %c0_i32_0 : i32
    scf.if %2 {
      %cst_20 = arith.constant 0.000000e+00 : f32
      %23 = vector.broadcast %cst_20 : f32 to vector<2x8x128xf32>
      %c0_21 = arith.constant 0 : index
      %c0_22 = arith.constant 0 : index
      %c0_23 = arith.constant 0 : index
      %c0_24 = arith.constant 0 : index
      %24 = vector.load %arg4[%c0_21, %c0_22, %c0_23, %c0_24] : memref<1x2x8x128xf32, #tpu.memory_space<vmem>>, vector<1x2x8x128xf32>
      %25 = vector.shape_cast %24 : vector<1x2x8x128xf32> to vector<2x8x128xf32>
      %26 = vector.shape_cast %23 : vector<2x8x128xf32> to vector<1x2x8x128xf32>
      tpu.vector_store %arg4[%c0_21, %c0_22, %c0_23, %c0_24], %26 {strides = array<i32>} : memref<1x2x8x128xf32, #tpu.memory_space<vmem>>, vector<1x2x8x128xf32>,
    } else {
    }
    %c0 = arith.constant 0 : index
    %c0_1 = arith.constant 0 : index
    %3 = vector.load %arg2[%c0, %c0_1] : memref<8x128xf32, #tpu.memory_space<vmem>>, vector<8x128xf32>
    %c0_2 = arith.constant 0 : index
    %c0_3 = arith.constant 0 : index
    %4 = vector.load %arg3[%c0_2, %c0_3] : memref<8x128xf32, #tpu.memory_space<vmem>>, vector<8x128xf32>
    %5 = arith.subf %3, %4 : vector<8x128xf32>
    %6 = vector.shape_cast %5 : vector<8x128xf32> to vector<1x8x128xf32>
    %c0_4 = arith.constant 0 : index
    %c0_5 = arith.constant 0 : index
    %c0_6 = arith.constant 0 : index
    %c0_7 = arith.constant 0 : index
    %7 = vector.load %arg4[%c0_4, %c0_5, %c0_6, %c0_7] : memref<1x2x8x128xf32, #tpu.memory_space<vmem>>, vector<1x1x8x128xf32>
    %8 = vector.shape_cast %7 : vector<1x1x8x128xf32> to vector<8x128xf32>
    %9 = arith.mulf %6, %6 : vector<1x8x128xf32>
    %cst = arith.constant dense<0.000000e+00> : vector<8x128xf32>
    %10 = vector.multi_reduction <add>, %9, %cst [0] : vector<1x8x128xf32> to vector<8x128xf32>
    %11 = arith.addf %8, %10 : vector<8x128xf32>
    %c0_8 = arith.constant 0 : index
    %c0_9 = arith.constant 0 : index
    %c0_10 = arith.constant 0 : index
    %c0_11 = arith.constant 0 : index
    %12 = vector.load %arg4[%c0_8, %c0_9, %c0_10, %c0_11] : memref<1x2x8x128xf32, #tpu.memory_space<vmem>>, vector<1x1x8x128xf32>
    %13 = vector.shape_cast %12 : vector<1x1x8x128xf32> to vector<8x128xf32>
    %14 = vector.shape_cast %11 : vector<8x128xf32> to vector<1x1x8x128xf32>
    tpu.vector_store %arg4[%c0_8, %c0_9, %c0_10, %c0_11], %14 {strides = array<i32>} : memref<1x2x8x128xf32, #tpu.memory_space<vmem>>, vector<1x1x8x128xf32>,
    %c0_12 = arith.constant 0 : index
    %c1 = arith.constant 1 : index
    %c0_13 = arith.constant 0 : index
    %c0_14 = arith.constant 0 : index
    %15 = vector.load %arg4[%c0_12, %c1, %c0_13, %c0_14] : memref<1x2x8x128xf32, #tpu.memory_space<vmem>>, vector<1x1x8x128xf32>
    %16 = vector.shape_cast %15 : vector<1x1x8x128xf32> to vector<8x128xf32>
    %17 = math.absf %6 : vector<1x8x128xf32>
    %cst_15 = arith.constant dense<0.000000e+00> : vector<8x128xf32>
    %18 = vector.multi_reduction <add>, %17, %cst_15 [0] : vector<1x8x128xf32> to vector<8x128xf32>
    %19 = arith.addf %16, %18 : vector<8x128xf32>
    %c0_16 = arith.constant 0 : index
    %c1_17 = arith.constant 1 : index
    %c0_18 = arith.constant 0 : index
    %c0_19 = arith.constant 0 : index
    %20 = vector.load %arg4[%c0_16, %c1_17, %c0_18, %c0_19] : memref<1x2x8x128xf32, #tpu.memory_space<vmem>>, vector<1x1x8x128xf32>
    %21 = vector.shape_cast %20 : vector<1x1x8x128xf32> to vector<8x128xf32>
    %22 = vector.shape_cast %19 : vector<8x128xf32> to vector<1x1x8x128xf32>
    tpu.vector_store %arg4[%c0_16, %c1_17, %c0_18, %c0_19], %22 {strides = array<i32>} : memref<1x2x8x128xf32, #tpu.memory_space<vmem>>, vector<1x1x8x128xf32>,
    return
  }
  func.func @transform_0(%arg0: i32, %arg1: i32) -> (i32, i32) {
    %c1_i32 = arith.constant 1 : i32
    %0 = arith.muli %arg0, %c1_i32 : i32
    %1 = arith.addi %0, %arg1 : i32
    %c0_i32 = arith.constant 0 : i32
    %c0_i32_0 = arith.constant 0 : i32
    return %1, %c0_i32 : i32, i32
  }
  func.func @transform_1(%arg0: i32, %arg1: i32) -> (i32, i32) {
    %c1_i32 = arith.constant 1 : i32
    %0 = arith.muli %arg0, %c1_i32 : i32
    %1 = arith.addi %0, %arg1 : i32
    %c0_i32 = arith.constant 0 : i32
    %c0_i32_0 = arith.constant 0 : i32
    return %1, %c0_i32 : i32, i32
  }
  func.func @transform_2(%arg0: i32, %arg1: i32) -> (i32, i32, i32, i32) {
    %c0_i32 = arith.constant 0 : i32
    %c0_i32_0 = arith.constant 0 : i32
    %c0_i32_1 = arith.constant 0 : i32
    %c0_i32_2 = arith.constant 0 : i32
    return %arg0, %c0_i32, %c0_i32_0, %c0_i32_1 : i32, i32, i32, i32
  }
}

</mosaic_0001>

<bundles_post_ra>
// kernel: _raw_losses.1
= control target key start
LH: loop header
LB: loop body
LE: loop exit
PB: predicated region body
PF: predicated region fallthrough
CT: control target
= control target key end

     0   :  { %s357_s9 = smov 0   ;;  %s359_s10 = smov 0   ;;  %s381_s0 = inlined_call_operand.vmem [shape: f32[16,128], index: 0, kind: input, shape index: {}]   ;;  %s382_s1 = inlined_call_operand.vmem [shape: f32[16,128], index: 1, kind: input, shape index: {}]   ;;  %s383_s2 = inlined_call_operand.vmem [shape: f32[2,2,8,128], index: 2, kind: output, shape index: {}]  }
   0x1   :  { %s361_s11 = smov 0  }
   0x2 LB: > { %s24_s12 = sadd.s32 1, %s336_s10  ;;  %p283_p0 = scmp.ge.s32.totalorder %s340_s11, 1  ;;  %s340_s11 = sphi %s361_s11, %s12_s11   ;;  %s336_s10 = sphi %s359_s10, %s385_s10   ;;  %s332_s9 = sphi %s357_s9, %s384_s9  }
   0x3   : > { %p26_p1 = scmp.ge.s32.totalorder %s24_s12, 2  ;;  %p140_p2 = scmp.lt.s32.totalorder %s340_s11, 3 }
   0x5   : > { %s387_s12 = smov (%p26_p1, %s24_s12), 0  ;;  %p141_p3 = pnand %p283_p0, %p140_p2 }
   0x6   : > { %p168_p4 = scmp.lt.s32.totalorder (!%p141_p3), %s332_s9, 1 }
   0x7   : > { %144 = sbr.rel (%p141_p3) target bundleno = 24 (0x18), region = 28 }
   0xe   : > { %s389_s9 = smov (!%p168_p4, %s332_s9), 1 }
   0xf   : > { %s284_s13 = sshll.u32 %s389_s9, 3  ;;  %s292_s20 = sshll.u32 %s389_s9, 4 }
  0x10   : > { %s171_s16 = scalar_lea.vmem %s381_s0, %s284_s13  ;;  %s177_s19 = scalar_lea.vmem %s382_s1, %s284_s13 }
  0x11   : > { %v190_v0 = vld [vmem:[%s171_s16] sm:$0xff]  ;;  %s183_s23 = scalar_lea.vmem %s383_s2, %s292_s20 }
  0x12   : > { %v191_v1 = vld [vmem:[%s177_s19] sm:$0xff] }
  0x13   : > { %v192_v2 = vsub.f32 %v190_v0, %v191_v1 }
  0x15   : > { %v194_v3 = vmul.f32 %v192_v2, %v192_v2  ;;  %v200_v4 = vand.u32 2147483647, %v192_v2 }
  0x17   : > { %197 = vst [vmem:[%s183_s23] sm:$0xff] %v194_v3  ;;  %289 = vst [vmem:[%s183_s23 + $0x8] sm:$0xff] %v200_v4 }
  0x18 PF: > { %s12_s11 = sadd.s32 1, %s340_s11   ;;  %s384_s9 = smov %s336_s10 }
  0x19   : > { %p9_p5 = scmp.ge.s32.totalorder %s12_s11, 4   ;;  %s385_s10 = smov %s387_s12 }
  0x1b   :  { %11 = sbr.rel (!%p9_p5) target bundleno = 2 (0x2), region = 66 }

</bundles_post_ra>
